<compile_context>
chip_gen: v7x
topology: tpu7x:2x2x1
jax: 0.10.0
libtpu: 0.0.40
codegen_flags: <defaults>
</compile_context>

<pallas_src>
import functools

import jax
import jax.numpy as jnp
from jax.experimental import pallas as pl
from jax.experimental.pallas import tpu as pltpu

_MIB = 1024 * 1024


def _round_up(x, m):
    return ((x + m - 1) // m) * m


def _vmem_capacity_bytes():
    try:
        return int(pltpu.get_tpu_info().vmem_capacity_bytes)
    except Exception:
        return 64 * _MIB  # conservative default (v7x-sized)


# --------------- resident-weight kernel (both weights live in VMEM) ---------
def _ffn_kernel_resident(x_ref, w1_ref, b1_ref, w2_ref, b2_ref, o_ref):
    # x_ref: (tm, D), w1_ref: (D, H), b1_ref: (1, H), w2_ref: (H, D), b2: (1, D)
    x = x_ref[...]
    h = jnp.dot(x, w1_ref[...], preferred_element_type=jnp.float32) + b1_ref[...]
    h = jnp.maximum(h, 0.0)  # F.relu
    y = jnp.dot(h.astype(w2_ref.dtype), w2_ref[...],
                preferred_element_type=jnp.float32) + b2_ref[...]
    o_ref[...] = y.astype(o_ref.dtype)


# --------------- hidden-dim tiled kernel (streams W1/W2 chunks) -------------
def _ffn_kernel_htiled(x_ref, w1_ref, b1_ref, w2_ref, b2_ref, o_ref, acc_ref):
    # grid = (M tiles, H chunks); H is the reduction axis (last, "arbitrary").
    h_idx = pl.program_id(1)

    @pl.when(h_idx == 0)
    def _():
        acc_ref[...] = jnp.zeros_like(acc_ref)

    x = x_ref[...]
    h = jnp.dot(x, w1_ref[...], preferred_element_type=jnp.float32) + b1_ref[...]
    h = jnp.maximum(h, 0.0)  # relu is per hidden unit -> exact under H tiling
    acc_ref[...] += jnp.dot(h.astype(w2_ref.dtype), w2_ref[...],
                            preferred_element_type=jnp.float32)

    @pl.when(h_idx == pl.num_programs(1) - 1)
    def _():
        o_ref[...] = (acc_ref[...] + b2_ref[...]).astype(o_ref.dtype)


@functools.partial(
    jax.jit,
    static_argnames=("tm", "compute_dtype", "single_buffer_weights",
                     "force_hidden_tiling", "hidden_tile"))
def _ffn_impl(x, w1, b1, w2, b2, *, tm, compute_dtype, single_buffer_weights,
              force_hidden_tiling=False, hidden_tile=None):
    B, S, D = x.shape
    H = w1.shape[1]
    M = B * S
    out_dtype = jnp.dtype(x.dtype)
    cdtype = jnp.dtype(compute_dtype) if compute_dtype is not None else out_dtype
    csize = cdtype.itemsize

    # ----- row tile: big enough to amortize per-step overhead, sublane (8)
    # aligned.  Try to pick one that divides M so we can skip the pad copy.
    tile = min(tm, _round_up(M, 8))
    if M % tile != 0:
        for cand in range(tile - 8, max(tile // 2, 8) - 1, -8):
            if M % cand == 0:
                tile = cand
                break

    x_flat = x.reshape(M, D).astype(cdtype)
    Mp = _round_up(M, tile)
    if Mp != M:  # ragged tail fallback only
        x_flat = jnp.pad(x_flat, ((0, Mp - M), (0, 0)))

    w1c = w1.astype(cdtype)
    w2c = w2.astype(cdtype)
    b1_2d = b1.reshape(1, H).astype(jnp.float32)
    b2_2d = b2.reshape(1, D).astype(jnp.float32)

    def _spec(shape, index_map, grid_invariant):
        if grid_invariant and single_buffer_weights:
            # constant index_map -> nothing to prefetch; don't double-buffer.
            return pl.BlockSpec(shape, index_map, pipeline_mode=pl.Buffered(1))
        return pl.BlockSpec(shape, index_map)

    # ----- choose resident vs hidden-tiled plan from a VMEM estimate --------
    cap = _vmem_capacity_bytes()
    budget = int(0.75 * cap)
    wbufs = 1 if single_buffer_weights else 2
    resident_need = (
        2 * D * H * csize * wbufs              # w1 + w2 resident
        + (H + D) * 4 * wbufs                  # biases
        + 2 * tile * D * csize                 # x tile (double buffered)
        + 2 * tile * D * out_dtype.itemsize    # out tile (double buffered)
        + tile * H * 4                         # (tm, H) f32 intermediate
    )
    use_htiling = bool(force_hidden_tiling) or (resident_need > budget)
    flops = 4 * Mp * D * H  # two matmuls, 2*M*D*H each

    if not use_htiling:
        vmem_limit = int(min(max(resident_need * 5 // 4, 32 * _MIB),
                             int(0.9 * cap)))
        cost = pl.CostEstimate(
            flops=flops, transcendentals=0,
            bytes_accessed=int(Mp * D * (csize + out_dtype.itemsize)
                               + 2 * D * H * csize + (H + D) * 4))
        out_flat = pl.pallas_call(
            _ffn_kernel_resident,
            out_shape=jax.ShapeDtypeStruct((Mp, D), out_dtype),
            grid_spec=pltpu.PrefetchScalarGridSpec(
                num_scalar_prefetch=0,
                grid=(Mp // tile,),
                in_specs=[
                    pl.BlockSpec((tile, D), lambda i: (i, 0)),   # x tile
                    _spec((D, H), lambda i: (0, 0), True),       # w1 resident
                    _spec((1, H), lambda i: (0, 0), True),       # b1
                    _spec((H, D), lambda i: (0, 0), True),       # w2 resident
                    _spec((1, D), lambda i: (0, 0), True),       # b2
                ],
                out_specs=pl.BlockSpec((tile, D), lambda i: (i, 0)),
            ),
            compiler_params=pltpu.CompilerParams(
                dimension_semantics=("parallel",),
                vmem_limit_bytes=vmem_limit),
            cost_estimate=cost,
        )(x_flat, w1c, b1_2d, w2c, b2_2d)
    else:
        # hidden-dim chunk: lane-aligned multiple of 128 that divides H,
        # falling back to the full H if none divides.
        if hidden_tile is not None:
            th = int(hidden_tile)
        else:
            th = H
            for cand in (2048, 1024, 512, 256, 128):
                if H % cand == 0:
                    th = cand
                    break
        nh = H // th
        htiled_need = (
            2 * 2 * D * th * csize               # w1/w2 chunks, double buffered
            + 2 * (th + D) * 4                   # bias chunks
            + 2 * tile * D * csize               # x tile
            + 2 * tile * D * out_dtype.itemsize  # out tile
            + tile * D * 4                       # f32 accumulator scratch
            + tile * th * 4                      # hidden chunk intermediate
        )
        vmem_limit = int(min(max(htiled_need * 5 // 4, 32 * _MIB),
                             int(0.9 * cap)))
        cost = pl.CostEstimate(
            flops=flops, transcendentals=0,
            bytes_accessed=int(Mp * D * (csize + out_dtype.itemsize)
                               + (Mp // tile) * 2 * D * H * csize
                               + (H + D) * 4))
        out_flat = pl.pallas_call(
            _ffn_kernel_htiled,
            out_shape=jax.ShapeDtypeStruct((Mp, D), out_dtype),
            grid_spec=pltpu.PrefetchScalarGridSpec(
                num_scalar_prefetch=0,
                grid=(Mp // tile, nh),
                in_specs=[
                    pl.BlockSpec((tile, D), lambda i, h: (i, 0)),  # x tile
                    pl.BlockSpec((D, th), lambda i, h: (0, h)),    # w1 chunk
                    pl.BlockSpec((1, th), lambda i, h: (0, h)),    # b1 chunk
                    pl.BlockSpec((th, D), lambda i, h: (h, 0)),    # w2 chunk
                    _spec((1, D), lambda i, h: (0, 0), True),      # b2
                ],
                out_specs=pl.BlockSpec((tile, D), lambda i, h: (i, 0)),
                scratch_shapes=[pltpu.VMEM((tile, D), jnp.float32)],
            ),
            compiler_params=pltpu.CompilerParams(
                dimension_semantics=("parallel", "arbitrary"),
                vmem_limit_bytes=vmem_limit),
            cost_estimate=cost,
        )(x_flat, w1c, b1_2d, w2c, b2_2d)

    return out_flat[:M].reshape(B, S, D)


def position_wise_ffn(x, w1, b1, w2, b2, *, tm=512, compute_dtype=None,
                      force_hidden_tiling=False, hidden_tile=None):
    """Position-wise FFN: Linear(D->H) -> relu -> Linear(H->D).

    x: (batch, seq, embed). Weights stored transposed vs torch nn.Linear:
    w1 (embed, hidden), w2 (hidden, embed).
    compute_dtype: optional MXU operand dtype (e.g. jnp.bfloat16); f32 accum.
    """
    try:
        out = _ffn_impl(x, w1, b1, w2, b2, tm=tm, compute_dtype=compute_dtype,
                        single_buffer_weights=True,
                        force_hidden_tiling=force_hidden_tiling,
                        hidden_tile=hidden_tile)
        return jax.block_until_ready(out)
    except Exception:
        # Fallback: default double-buffered specs (slightly more VMEM, always valid).
        out = _ffn_impl(x, w1, b1, w2, b2, tm=tm, compute_dtype=compute_dtype,
                        single_buffer_weights=False,
                        force_hidden_tiling=force_hidden_tiling,
                        hidden_tile=hidden_tile)
        return jax.block_until_ready(out)


if __name__ == "__main__":
    # Small shapes consistent with the module: (batch, seq, embedding_dim)
    batch, seq, embed, hidden = 2, 8, 32, 64

    key = jax.random.PRNGKey(0)
    kx, kw1, kb1, kw2, kb2 = jax.random.split(key, 5)

    x = jax.random.normal(kx, (batch, seq, embed), dtype=jnp.float32)
    # Deterministic "Linear" params (stored transposed vs torch: (in, out)).
    w1 = jax.random.normal(kw1, (embed, hidden), dtype=jnp.float32) * 0.05
    b1 = jax.random.normal(kb1, (hidden,), dtype=jnp.float32) * 0.05
    w2 = jax.random.normal(kw2, (hidden, embed), dtype=jnp.float32) * 0.05
    b2 = jax.random.normal(kb2, (embed,), dtype=jnp.float32) * 0.05

    ref = jnp.maximum(x @ w1 + b1, 0.0) @ w2 + b2

    # 1) f32 path — exact semantics of the torch module.
    out = position_wise_ffn(x, w1, b1, w2, b2)
    assert out.shape == (batch, seq, embed)
    assert jnp.allclose(out, ref, atol=1e-5, rtol=1e-5)

    # 2) bf16 MXU-operand path (recommended production config), f32 accumulation.
    out_bf16 = position_wise_ffn(x, w1, b1, w2, b2, compute_dtype=jnp.bfloat16)
    assert jnp.allclose(out_bf16, ref, atol=5e-2, rtol=5e-2)

    # 3) Hidden-dim-tiled reduction path (auto-selected for huge H/D; forced
    #    here at a small size with 2 hidden chunks to validate the accumulator).
    hidden2 = 256
    w1b = jax.random.normal(kw1, (embed, hidden2), dtype=jnp.float32) * 0.05
    b1b = jax.random.normal(kb1, (hidden2,), dtype=jnp.float32) * 0.05
    w2b = jax.random.normal(kw2, (hidden2, embed), dtype=jnp.float32) * 0.05
    ref2 = jnp.maximum(x @ w1b + b1b, 0.0) @ w2b + b2
    out2 = position_wise_ffn(x, w1b, b1b, w2b, b2,
                             force_hidden_tiling=True, hidden_tile=128)
    assert jnp.allclose(out2, ref2, atol=1e-5, rtol=1e-5)

    print("KERNEL_OK")
</pallas_src>

<mosaic_0001>
module attributes {stable_mosaic.version = 11 : i64} {
  func.func @_ffn_kernel_resident(%arg0: i32, %arg1: memref<16x32xf32, #tpu.memory_space<vmem>>, %arg2: memref<32x64xf32, #tpu.memory_space<vmem>>, %arg3: memref<1x64xf32, #tpu.memory_space<vmem>>, %arg4: memref<64x32xf32, #tpu.memory_space<vmem>>, %arg5: memref<1x32xf32, #tpu.memory_space<vmem>>, %arg6: memref<16x32xf32, #tpu.memory_space<vmem>>) attributes {dimension_semantics = [#tpu.dimension_semantics<parallel>], iteration_bounds = array<i64: 1>, scalar_prefetch = 0 : i64, scratch_operands = 0 : i64, tpu.core_type = #tpu.core_type<tc>, window_params = [{transform_indices = @transform_0, window_bounds = array<i64: 16, 32>}, {pipeline_mode = #tpu.pipeline_mode<synchronous>, transform_indices = @transform_1, window_bounds = array<i64: 32, 64>}, {pipeline_mode = #tpu.pipeline_mode<synchronous>, transform_indices = @transform_2, window_bounds = array<i64: 1, 64>}, {pipeline_mode = #tpu.pipeline_mode<synchronous>, transform_indices = @transform_3, window_bounds = array<i64: 64, 32>}, {pipeline_mode = #tpu.pipeline_mode<synchronous>, transform_indices = @transform_4, window_bounds = array<i64: 1, 32>}, {transform_indices = @transform_5, window_bounds = array<i64: 16, 32>}]} {
    %c0 = arith.constant 0 : index
    %c0_0 = arith.constant 0 : index
    %0 = vector.load %arg1[%c0, %c0_0] : memref<16x32xf32, #tpu.memory_space<vmem>>, vector<16x32xf32>
    %c0_1 = arith.constant 0 : index
    %c0_2 = arith.constant 0 : index
    %1 = vector.load %arg2[%c0_1, %c0_2] : memref<32x64xf32, #tpu.memory_space<vmem>>, vector<32x64xf32>
    %cst = arith.constant dense<0.000000e+00> : vector<16x64xf32>
    %2 = tpu.matmul %0, %1, %cst {dimension_numbers = #tpu.dot_dimension_numbers<[1], [0], [0], [1], [0, 0, 1, 1], [], []>} : vector<16x32xf32>, vector<32x64xf32>, vector<16x64xf32> -> vector<16x64xf32>
    %c0_3 = arith.constant 0 : index
    %c0_4 = arith.constant 0 : index
    %3 = vector.load %arg3[%c0_3, %c0_4] : memref<1x64xf32, #tpu.memory_space<vmem>>, vector<1x64xf32>
    %4 = vector.broadcast %3 : vector<1x64xf32> to vector<16x64xf32>
    %5 = arith.addf %2, %4 : vector<16x64xf32>
    %cst_5 = arith.constant 0.000000e+00 : f32
    %6 = vector.broadcast %cst_5 : f32 to vector<16x64xf32>
    %7 = arith.maximumf %5, %6 : vector<16x64xf32>
    %c0_6 = arith.constant 0 : index
    %c0_7 = arith.constant 0 : index
    %8 = vector.load %arg4[%c0_6, %c0_7] : memref<64x32xf32, #tpu.memory_space<vmem>>, vector<64x32xf32>
    %cst_8 = arith.constant dense<0.000000e+00> : vector<16x32xf32>
    %9 = tpu.matmul %7, %8, %cst_8 {dimension_numbers = #tpu.dot_dimension_numbers<[1], [0], [0], [1], [0, 0, 1, 1], [], []>} : vector<16x64xf32>, vector<64x32xf32>, vector<16x32xf32> -> vector<16x32xf32>
    %c0_9 = arith.constant 0 : index
    %c0_10 = arith.constant 0 : index
    %10 = vector.load %arg5[%c0_9, %c0_10] : memref<1x32xf32, #tpu.memory_space<vmem>>, vector<1x32xf32>
    %11 = vector.broadcast %10 : vector<1x32xf32> to vector<16x32xf32>
    %12 = arith.addf %9, %11 : vector<16x32xf32>
    %c0_11 = arith.constant 0 : index
    %c0_12 = arith.constant 0 : index
    %13 = vector.load %arg6[%c0_11, %c0_12] : memref<16x32xf32, #tpu.memory_space<vmem>>, vector<16x32xf32>
    tpu.vector_store %arg6[%c0_11, %c0_12], %12 {strides = array<i32>} : memref<16x32xf32, #tpu.memory_space<vmem>>, vector<16x32xf32>,
    return
  }
  func.func @transform_0(%arg0: i32) -> (i32, i32) {
    %c0_i32 = arith.constant 0 : i32
    %c0_i32_0 = arith.constant 0 : i32
    return %arg0, %c0_i32 : i32, i32
  }
  func.func @transform_1(%arg0: i32) -> (i32, i32) {
    %c0_i32 = arith.constant 0 : i32
    %c0_i32_0 = arith.constant 0 : i32
    %c0_i32_1 = arith.constant 0 : i32
    return %c0_i32, %c0_i32_0 : i32, i32
  }
  func.func @transform_2(%arg0: i32) -> (i32, i32) {
    %c0_i32 = arith.constant 0 : i32
    %c0_i32_0 = arith.constant 0 : i32
    %c0_i32_1 = arith.constant 0 : i32
    return %c0_i32, %c0_i32_0 : i32, i32
  }
  func.func @transform_3(%arg0: i32) -> (i32, i32) {
    %c0_i32 = arith.constant 0 : i32
    %c0_i32_0 = arith.constant 0 : i32
    %c0_i32_1 = arith.constant 0 : i32
    return %c0_i32, %c0_i32_0 : i32, i32
  }
  func.func @transform_4(%arg0: i32) -> (i32, i32) {
    %c0_i32 = arith.constant 0 : i32
    %c0_i32_0 = arith.constant 0 : i32
    %c0_i32_1 = arith.constant 0 : i32
    return %c0_i32, %c0_i32_0 : i32, i32
  }
  func.func @transform_5(%arg0: i32) -> (i32, i32) {
    %c0_i32 = arith.constant 0 : i32
    %c0_i32_0 = arith.constant 0 : i32
    return %arg0, %c0_i32 : i32, i32
  }
}

module attributes {stable_mosaic.version = 11 : i64} {
  func.func @_ffn_kernel_resident(%arg0: i32, %arg1: memref<16x32xf32, #tpu.memory_space<vmem>>, %arg2: memref<32x64xf32, #tpu.memory_space<vmem>>, %arg3: memref<1x64xf32, #tpu.memory_space<vmem>>, %arg4: memref<64x32xf32, #tpu.memory_space<vmem>>, %arg5: memref<1x32xf32, #tpu.memory_space<vmem>>, %arg6: memref<16x32xf32, #tpu.memory_space<vmem>>) attributes {dimension_semantics = [#tpu.dimension_semantics<parallel>], iteration_bounds = array<i64: 1>, scalar_prefetch = 0 : i64, scratch_operands = 0 : i64, tpu.core_type = #tpu.core_type<tc>, window_params = [{transform_indices = @transform_0, window_bounds = array<i64: 16, 32>}, {pipeline_mode = #tpu.pipeline_mode<synchronous>, transform_indices = @transform_1, window_bounds = array<i64: 32, 64>}, {pipeline_mode = #tpu.pipeline_mode<synchronous>, transform_indices = @transform_2, window_bounds = array<i64: 1, 64>}, {pipeline_mode = #tpu.pipeline_mode<synchronous>, transform_indices = @transform_3, window_bounds = array<i64: 64, 32>}, {pipeline_mode = #tpu.pipeline_mode<synchronous>, transform_indices = @transform_4, window_bounds = array<i64: 1, 32>}, {transform_indices = @transform_5, window_bounds = array<i64: 16, 32>}]} {
    %c0 = arith.constant 0 : index
    %c0_0 = arith.constant 0 : index
    %0 = vector.load %arg1[%c0, %c0_0] : memref<16x32xf32, #tpu.memory_space<vmem>>, vector<16x32xf32>
    %c0_1 = arith.constant 0 : index
    %c0_2 = arith.constant 0 : index
    %1 = vector.load %arg2[%c0_1, %c0_2] : memref<32x64xf32, #tpu.memory_space<vmem>>, vector<32x64xf32>
    %cst = arith.constant dense<0.000000e+00> : vector<16x64xf32>
    %2 = tpu.matmul %0, %1, %cst {dimension_numbers = #tpu.dot_dimension_numbers<[1], [0], [0], [1], [0, 0, 1, 1], [], []>} : vector<16x32xf32>, vector<32x64xf32>, vector<16x64xf32> -> vector<16x64xf32>
    %c0_3 = arith.constant 0 : index
    %c0_4 = arith.constant 0 : index
    %3 = vector.load %arg3[%c0_3, %c0_4] : memref<1x64xf32, #tpu.memory_space<vmem>>, vector<1x64xf32>
    %4 = vector.broadcast %3 : vector<1x64xf32> to vector<16x64xf32>
    %5 = arith.addf %2, %4 : vector<16x64xf32>
    %cst_5 = arith.constant 0.000000e+00 : f32
    %6 = vector.broadcast %cst_5 : f32 to vector<16x64xf32>
    %7 = arith.maximumf %5, %6 : vector<16x64xf32>
    %c0_6 = arith.constant 0 : index
    %c0_7 = arith.constant 0 : index
    %8 = vector.load %arg4[%c0_6, %c0_7] : memref<64x32xf32, #tpu.memory_space<vmem>>, vector<64x32xf32>
    %cst_8 = arith.constant dense<0.000000e+00> : vector<16x32xf32>
    %9 = tpu.matmul %7, %8, %cst_8 {dimension_numbers = #tpu.dot_dimension_numbers<[1], [0], [0], [1], [0, 0, 1, 1], [], []>} : vector<16x64xf32>, vector<64x32xf32>, vector<16x32xf32> -> vector<16x32xf32>
    %c0_9 = arith.constant 0 : index
    %c0_10 = arith.constant 0 : index
    %10 = vector.load %arg5[%c0_9, %c0_10] : memref<1x32xf32, #tpu.memory_space<vmem>>, vector<1x32xf32>
    %11 = vector.broadcast %10 : vector<1x32xf32> to vector<16x32xf32>
    %12 = arith.addf %9, %11 : vector<16x32xf32>
    %c0_11 = arith.constant 0 : index
    %c0_12 = arith.constant 0 : index
    %13 = vector.load %arg6[%c0_11, %c0_12] : memref<16x32xf32, #tpu.memory_space<vmem>>, vector<16x32xf32>
    tpu.vector_store %arg6[%c0_11, %c0_12], %12 {strides = array<i32>} : memref<16x32xf32, #tpu.memory_space<vmem>>, vector<16x32xf32>,
    return
  }
  func.func @transform_0(%arg0: i32) -> (i32, i32) {
    %c0_i32 = arith.constant 0 : i32
    %c0_i32_0 = arith.constant 0 : i32
    return %arg0, %c0_i32 : i32, i32
  }
  func.func @transform_1(%arg0: i32) -> (i32, i32) {
    %c0_i32 = arith.constant 0 : i32
    %c0_i32_0 = arith.constant 0 : i32
    %c0_i32_1 = arith.constant 0 : i32
    return %c0_i32, %c0_i32_0 : i32, i32
  }
  func.func @transform_2(%arg0: i32) -> (i32, i32) {
    %c0_i32 = arith.constant 0 : i32
    %c0_i32_0 = arith.constant 0 : i32
    %c0_i32_1 = arith.constant 0 : i32
    return %c0_i32, %c0_i32_0 : i32, i32
  }
  func.func @transform_3(%arg0: i32) -> (i32, i32) {
    %c0_i32 = arith.constant 0 : i32
    %c0_i32_0 = arith.constant 0 : i32
    %c0_i32_1 = arith.constant 0 : i32
    return %c0_i32, %c0_i32_0 : i32, i32
  }
  func.func @transform_4(%arg0: i32) -> (i32, i32) {
    %c0_i32 = arith.constant 0 : i32
    %c0_i32_0 = arith.constant 0 : i32
    %c0_i32_1 = arith.constant 0 : i32
    return %c0_i32, %c0_i32_0 : i32, i32
  }
  func.func @transform_5(%arg0: i32) -> (i32, i32) {
    %c0_i32 = arith.constant 0 : i32
    %c0_i32_0 = arith.constant 0 : i32
    return %arg0, %c0_i32 : i32, i32
  }
}

</mosaic_0001>

<bundles_post_ra>
// kernel: _ffn_impl.1
= control target key start
LH: loop header
LB: loop body
LE: loop exit
PB: predicated region body
PF: predicated region fallthrough
CT: control target
= control target key end

     0   :  { %vm34_vm0 = vcmask 261120   ;;  %s433_s0 = inlined_call_operand.vmem [shape: f32[16,32], index: 0, kind: input, shape index: {}]   ;;  %s434_s1 = inlined_call_operand.vmem [shape: f32[32,64], index: 1, kind: input, shape index: {}]   ;;  %s435_s2 = inlined_call_operand.vmem [shape: f32[1,64], index: 2, kind: input, shape index: {}]   ;;  %s436_s3 = inlined_call_operand.vmem [shape: f32[64,32], index: 3, kind: input, shape index: {}]   ;;  %s437_s4 = inlined_call_operand.vmem [shape: f32[1,32], index: 4, kind: input, shape index: {}]   ;;  %s438_s5 = inlined_call_operand.hbm [shape: f32[16,32], index: 5, kind: output, shape index: {}]  }
   0x1   :  { %v23_v0 = vld [vmem:[%s434_s1] sm:$0xff]  ;;  %v24_v1 = vld [vmem:[%s434_s1 + $0x8] sm:$0xff]  ;;  %v25_v2 = vld [vmem:[%s434_s1 + $0x10] sm:$0xff] }
   0x2   :  { %v285_v3 = vpack.c.bf16 %v24_v1, %v23_v0  ;;  %v26_v4 = vld [vmem:[%s434_s1 + $0x18] sm:$0xff]  ;;  %v21_v5 = vld [vmem:[%s433_s0] sm:$0xff]  ;;  %v119_v8 = vld [vmem:[%s436_s3 + $0x8] sm:$0xff] }
   0x3   :  { %v289_v6 = vpack.c.bf16 %v26_v4, %v25_v2  ;;  %263 = vmatprep.mubr.msk.f32.mxu0 %vm34_vm0, %v21_v5  ;;  %v118_v7 = vld [vmem:[%s436_s3] sm:$0xff]  ;;  %v120_v9 = vld [vmem:[%s436_s3 + $0x10] sm:$0xff]  ;;  %v121_v11 = vld [vmem:[%s436_s3 + $0x18] sm:$0xff] }
   0x4   :  { %286 = vmatprep.subr.bf16.mxu0 %v285_v3  ;;  %v293_v10 = vpack.c.bf16 %v119_v8, %v118_v7  ;;  %v297_v12 = vpack.c.bf16 %v121_v11, %v120_v9  ;;  %v122_v13 = vld [vmem:[%s436_s3 + $0x20] sm:$0xff]  ;;  %v123_v14 = vld [vmem:[%s436_s3 + $0x28] sm:$0xff] }
   0x5   :  { %288 = vmatpush3.bf16.msra.mxu0 %v285_v3 }
   0x6   :  { %10 = vsyncpa [#allocation3], 0  ;;  %290 = vmatprep.subr.bf16.mxu0 %v289_v6  ;;  %294 = vmatprep.subr.bf16.mxu1 %v293_v10  ;;  %v301_v15 = vpack.c.bf16 %v123_v14, %v122_v13  ;;  %v22_v16 = vld [vmem:[%s433_s0 + $0x8] sm:$0xff]  ;;  %v124_v17 = vld [vmem:[%s436_s3 + $0x30] sm:$0xff]  ;;  %vm133_vm1 = vcmask 523264  }
   0x7   :  { %296 = vmatpush3.bf16.msra.mxu1 %v293_v10  ;;  %v125_v18 = vld [vmem:[%s436_s3 + $0x38] sm:$0xff]  ;;  %v233_v20 = vld [vmem:[%s435_s2] ss:$0 sm:$0xff]  ;;  %s336_s3 = smov [#allocation2]  }
   0x8   :  { %298 = vmatprep.subr.bf16.mxu1 %v297_v12  ;;  %v305_v19 = vpack.c.bf16 %v125_v18, %v124_v17  ;;  %v236_v27 = vld [vmem:[%s437_s4] ss:$0 sm:$0xff]  ;;  %s222_s23 = sshll.u32 %s336_s3, 4  ;;  %s223_s23 = int_to_ptr.vmem [resolvable:$true] %s222_s23 }
   0x9   :  { %292 = vmatpush3.bf16.msra.mxu0 %v289_v6  ;;  %s312_s2 = scalar_lea.vmem %s223_s23, 256  ;;  %p317_p1 = scmp.lt.s32.totalorder %s223_s23, %s223_s23 }
   0xa   :  { %p313_p0 = scmp.ne.s32.totalorder %s223_s23, %s312_s2  ;;  %p318_p2 = scmp.lt.s32.totalorder %s312_s2, %s312_s2 }
   0xb   :  { %300 = vmatpush3.bf16.msra.mxu1 %v297_v12 }
   0xc   :  { %264 = vmatmul.mubr.msk.f32.vlgmr.msra.gmra.mrb[0].mxu0 %vm34_vm0, %v22_v16  ;;  %302 = vmatprep.subr.bf16.mxu1 %v301_v15  ;;  %p319_p3 = por %p318_p2, %p317_p1 }
   0xe   :  { %p320_p4 = pnand %p319_p3, %p313_p0 }
   0xf   :  { %304 = vmatpush3.bf16.msra.mxu1 %v301_v15 }
  0x10   :  { %306 = vmatprep.subr.bf16.mxu1 %v305_v19 }
  0x13   :  { %308 = vmatpush3.bf16.msra.mxu1 %v305_v19 }
  0xdf   :  { %v265_v21 = vpop.f32.mrb[0].mxu0 }
  0xe0   :  { %v113_v22 = vadd.f32 %v265_v21, %v233_v20  ;;  %v107_v23 = vpop.f32.mrb[1].mxu0 }
  0xe1   :  { %v108_v24 = vadd.f32 %v233_v20, %v107_v23 }
  0xe2   :  { %v117_v26 = vmax.f32 %v113_v22, 0.0 }
  0xe3   :  { %v116_v25 = vmax.f32 %v108_v24, 0.0 }
  0xe5   :  { %282 = vmatprep.mubr.msk.f32.mxu1 %vm133_vm1, %v116_v25 }
  0xe6   :  { %283 = vmatmul.mubr.msk.f32.vlgmr.msra.gmra.mrb[0].mxu1 %vm133_vm1, %v117_v26 }
 0x1b9   :  { %v284_v28 = vpop.f32.mrb[0].mxu1 }
 0x1ba   :  { %v212_v29 = vadd.f32 %v284_v28, %v236_v27  ;;  %v206_v30 = vpop.f32.mrb[1].mxu1 }
 0x1bb   :  { %v207_v31 = vadd.f32 %v236_v27, %v206_v30 }
 0x1bc   :  { %216 = vst.msk [vmem:[#allocation2 + $0x8] sm:$0xff] %vm34_vm0, %v212_v29 }
 0x1bd   :  { %215 = vst.msk [vmem:[#allocation2] sm:$0xff] %vm34_vm0, %v207_v31 }
 0x1be   :  { %323 = shalt.err (!%p320_p4)
}
 0x1bf   :  { %s324_s25 = scalar_lea.hbm %s438_s5, 256 }
 0x1c0   :  { %p325_p5 = scmp.ne.s32.totalorder %s438_s5, %s324_s25  ;;  %p328_p6 = scmp.lt.u32.totalorder %s324_s25, %s438_s5 }
 0x1c2   :  { %p330_p7 = pnand %p328_p6, %p325_p5 }
 0x1c4   :  { %333 = shalt.err (!%p330_p7)
}
 0x1c5   :  { %s337_s30 = smov 128   ;;  %s338_s6 = smov 8  }
 0x1c6   :  { %228 = dma.vmem_to_hbm [thread:$0]  %s223_s23, 256, %s438_s5, [#allocation3], %s337_s30, %s337_s30, %s338_s6  }
 0x1c7   :  { %334 = dma.done.wait [#allocation3], 256  }
 0x1c8   :  { %335 = vsyncadd [#allocation3], 4294967040 }
 0x1c9   :  { %232 = vsyncpa [#allocation3], 1 }

// kernel: _ffn_impl.1
= control target key start
LH: loop header
LB: loop body
LE: loop exit
PB: predicated region body
PF: predicated region fallthrough
CT: control target
= control target key end

     0   :  { %vm34_vm0 = vcmask 261120   ;;  %s433_s0 = inlined_call_operand.vmem [shape: f32[16,32], index: 0, kind: input, shape index: {}]   ;;  %s434_s1 = inlined_call_operand.vmem [shape: f32[32,64], index: 1, kind: input, shape index: {}]   ;;  %s435_s2 = inlined_call_operand.vmem [shape: f32[1,64], index: 2, kind: input, shape index: {}]   ;;  %s436_s3 = inlined_call_operand.vmem [shape: f32[64,32], index: 3, kind: input, shape index: {}]   ;;  %s437_s4 = inlined_call_operand.vmem [shape: f32[1,32], index: 4, kind: input, shape index: {}]   ;;  %s438_s5 = inlined_call_operand.hbm [shape: f32[16,32], index: 5, kind: output, shape index: {}]  }
   0x1   :  { %v23_v0 = vld [vmem:[%s434_s1] sm:$0xff]  ;;  %v24_v1 = vld [vmem:[%s434_s1 + $0x8] sm:$0xff]  ;;  %v25_v2 = vld [vmem:[%s434_s1 + $0x10] sm:$0xff] }
   0x2   :  { %v285_v3 = vpack.c.bf16 %v24_v1, %v23_v0  ;;  %v26_v4 = vld [vmem:[%s434_s1 + $0x18] sm:$0xff]  ;;  %v21_v5 = vld [vmem:[%s433_s0] sm:$0xff]  ;;  %v119_v8 = vld [vmem:[%s436_s3 + $0x8] sm:$0xff] }
   0x3   :  { %v289_v6 = vpack.c.bf16 %v26_v4, %v25_v2  ;;  %263 = vmatprep.mubr.msk.f32.mxu0 %vm34_vm0, %v21_v5  ;;  %v118_v7 = vld [vmem:[%s436_s3] sm:$0xff]  ;;  %v120_v9 = vld [vmem:[%s436_s3 + $0x10] sm:$0xff]  ;;  %v121_v11 = vld [vmem:[%s436_s3 + $0x18] sm:$0xff] }
   0x4   :  { %286 = vmatprep.subr.bf16.mxu0 %v285_v3  ;;  %v293_v10 = vpack.c.bf16 %v119_v8, %v118_v7  ;;  %v297_v12 = vpack.c.bf16 %v121_v11, %v120_v9  ;;  %v122_v13 = vld [vmem:[%s436_s3 + $0x20] sm:$0xff]  ;;  %v123_v14 = vld [vmem:[%s436_s3 + $0x28] sm:$0xff] }
   0x5   :  { %288 = vmatpush3.bf16.msra.mxu0 %v285_v3 }
   0x6   :  { %10 = vsyncpa [#allocation3], 0  ;;  %290 = vmatprep.subr.bf16.mxu0 %v289_v6  ;;  %294 = vmatprep.subr.bf16.mxu1 %v293_v10  ;;  %v301_v15 = vpack.c.bf16 %v123_v14, %v122_v13  ;;  %v22_v16 = vld [vmem:[%s433_s0 + $0x8] sm:$0xff]  ;;  %v124_v17 = vld [vmem:[%s436_s3 + $0x30] sm:$0xff]  ;;  %vm133_vm1 = vcmask 523264  }
   0x7   :  { %296 = vmatpush3.bf16.msra.mxu1 %v293_v10  ;;  %v125_v18 = vld [vmem:[%s436_s3 + $0x38] sm:$0xff]  ;;  %v233_v20 = vld [vmem:[%s435_s2] ss:$0 sm:$0xff]  ;;  %s336_s3 = smov [#allocation2]  }
   0x8   :  { %298 = vmatprep.subr.bf16.mxu1 %v297_v12  ;;  %v305_v19 = vpack.c.bf16 %v125_v18, %v124_v17  ;;  %v236_v27 = vld [vmem:[%s437_s4] ss:$0 sm:$0xff]  ;;  %s222_s23 = sshll.u32 %s336_s3, 4  ;;  %s223_s23 = int_to_ptr.vmem [resolvable:$true] %s222_s23 }
   0x9   :  { %292 = vmatpush3.bf16.msra.mxu0 %v289_v6  ;;  %s312_s2 = scalar_lea.vmem %s223_s23, 256  ;;  %p317_p1 = scmp.lt.s32.totalorder %s223_s23, %s223_s23 }
   0xa   :  { %p313_p0 = scmp.ne.s32.totalorder %s223_s23, %s312_s2  ;;  %p318_p2 = scmp.lt.s32.totalorder %s312_s2, %s312_s2 }
   0xb   :  { %300 = vmatpush3.bf16.msra.mxu1 %v297_v12 }
   0xc   :  { %264 = vmatmul.mubr.msk.f32.vlgmr.msra.gmra.mrb[0].mxu0 %vm34_vm0, %v22_v16  ;;  %302 = vmatprep.subr.bf16.mxu1 %v301_v15  ;;  %p319_p3 = por %p318_p2, %p317_p1 }
   0xe   :  { %p320_p4 = pnand %p319_p3, %p313_p0 }
   0xf   :  { %304 = vmatpush3.bf16.msra.mxu1 %v301_v15 }
  0x10   :  { %306 = vmatprep.subr.bf16.mxu1 %v305_v19 }
  0x13   :  { %308 = vmatpush3.bf16.msra.mxu1 %v305_v19 }
  0xdf   :  { %v265_v21 = vpop.f32.mrb[0].mxu0 }
  0xe0   :  { %v113_v22 = vadd.f32 %v265_v21, %v233_v20  ;;  %v107_v23 = vpop.f32.mrb[1].mxu0 }
  0xe1   :  { %v108_v24 = vadd.f32 %v233_v20, %v107_v23 }
  0xe2   :  { %v117_v26 = vmax.f32 %v113_v22, 0.0 }
  0xe3   :  { %v116_v25 = vmax.f32 %v108_v24, 0.0 }
  0xe5   :  { %282 = vmatprep.mubr.msk.f32.mxu1 %vm133_vm1, %v116_v25 }
  0xe6   :  { %283 = vmatmul.mubr.msk.f32.vlgmr.msra.gmra.mrb[0].mxu1 %vm133_vm1, %v117_v26 }
 0x1b9   :  { %v284_v28 = vpop.f32.mrb[0].mxu1 }
 0x1ba   :  { %v212_v29 = vadd.f32 %v284_v28, %v236_v27  ;;  %v206_v30 = vpop.f32.mrb[1].mxu1 }
 0x1bb   :  { %v207_v31 = vadd.f32 %v236_v27, %v206_v30 }
 0x1bc   :  { %216 = vst.msk [vmem:[#allocation2 + $0x8] sm:$0xff] %vm34_vm0, %v212_v29 }
 0x1bd   :  { %215 = vst.msk [vmem:[#allocation2] sm:$0xff] %vm34_vm0, %v207_v31 }
 0x1be   :  { %323 = shalt.err (!%p320_p4)
}
 0x1bf   :  { %s324_s25 = scalar_lea.hbm %s438_s5, 256 }
 0x1c0   :  { %p325_p5 = scmp.ne.s32.totalorder %s438_s5, %s324_s25  ;;  %p328_p6 = scmp.lt.u32.totalorder %s324_s25, %s438_s5 }
 0x1c2   :  { %p330_p7 = pnand %p328_p6, %p325_p5 }
 0x1c4   :  { %333 = shalt.err (!%p330_p7)
}
 0x1c5   :  { %s337_s30 = smov 128   ;;  %s338_s6 = smov 8  }
 0x1c6   :  { %228 = dma.vmem_to_hbm [thread:$0]  %s223_s23, 256, %s438_s5, [#allocation3], %s337_s30, %s337_s30, %s338_s6  }
 0x1c7   :  { %334 = dma.done.wait [#allocation3], 256  }
 0x1c8   :  { %335 = vsyncadd [#allocation3], 4294967040 }
 0x1c9   :  { %232 = vsyncpa [#allocation3], 1 }

</bundles_post_ra>
